<compile_context>
chip_gen: v7x
topology: tpu7x:2x2x1
jax: 0.10.0
libtpu: 0.0.40
codegen_flags: <defaults>
</compile_context>

<pallas_src>
import jax
import jax.numpy as jnp
from jax.experimental import pallas as pl
from jax.experimental.pallas import tpu as pltpu

LOG_SIG_MAX = 2.0
LOG_SIG_MIN = -20.0


def _policy_fwd_kernel(x_ref, w1_ref, w2_ref, w3_ref, wh_ref, bh_ref, out_ref):
    f32 = jnp.float32
    bf16 = jnp.bfloat16

    # Shared trunk: bf16 operands, f32 accumulation, ReLU between layers.
    h = jnp.dot(x_ref[...], w1_ref[...], preferred_element_type=f32)
    h = jnp.maximum(h, 0.0).astype(bf16)

    h = jnp.dot(h, w2_ref[...], preferred_element_type=f32)
    h = jnp.maximum(h, 0.0).astype(bf16)

    h = jnp.dot(h, w3_ref[...], preferred_element_type=f32)
    h = jnp.maximum(h, 0.0).astype(bf16)

    # Packed head: columns [0:A) = mean, [A:2A) = log_std (pre-clip), rest pad.
    head = jnp.dot(h, wh_ref[...], preferred_element_type=f32) + bh_ref[...]
    out_ref[...] = head.astype(out_ref.dtype)


def _round_up(x, m):
    return (x + m - 1) // m * m


@jax.jit
def ewc_gaussian_policy_forward(state, w1, w2, w3, wm, bm, ws, bs):
    """state: (B, num_inputs); w1: (H, num_inputs); w2: (H, H); w3: (F, H);
    wm/ws: (A, F); bm/bs: (A,).  Returns (mean, log_std), each (B, A) f32."""
    B, num_inputs = state.shape
    hidden_dim = w1.shape[0]
    feat_dim = w3.shape[0]
    num_actions = wm.shape[0]

    # Packed-head width (lane-dense output).
    head_p = _round_up(2 * num_actions, 128)

    # Batch tiling: cap tile at 1024, guarantee >=2 tiles when there is enough
    # work so both v7x TensorCores are used, keep TB a multiple of 16 (bf16
    # sublane packing).  Waste per call is < 16 rows.
    TB_MAX = 1024
    n_tiles = pl.cdiv(B, TB_MAX)
    if B >= 32:
        n_tiles = max(n_tiles, 2)
    TB = _round_up(pl.cdiv(B, n_tiles), 16)
    Bp = TB * n_tiles

    bf16 = jnp.bfloat16
    x_p = state
    if Bp != B:
        x_p = jnp.pad(x_p, ((0, Bp - B), (0, 0)))
    x_p = x_p.astype(bf16)

    # One-time HBM-side weight transposes (so in-kernel matmuls are plain dots,
    # no per-step transpose on the hot path) + head packing.
    w1t = w1.T.astype(bf16)                               # (in, H)
    w2t = w2.T.astype(bf16)                               # (H, H)
    w3t = w3.T.astype(bf16)                               # (H, F)
    wh = jnp.concatenate([wm, ws], axis=0)                # (2A, F)
    wh_t = jnp.pad(wh.T, ((0, 0), (0, head_p - 2 * num_actions))).astype(bf16)
    bh = jnp.pad(jnp.concatenate([bm, bs]),
                 (0, head_p - 2 * num_actions))[None, :].astype(jnp.float32)

    flops = 2 * Bp * (hidden_dim * num_inputs + hidden_dim * hidden_dim
                      + feat_dim * hidden_dim + head_p * feat_dim)
    bytes_accessed = (2 * (Bp * num_inputs                    # bf16 state read
                           + hidden_dim * num_inputs + hidden_dim * hidden_dim
                           + feat_dim * hidden_dim + feat_dim * head_p)
                      + 4 * (head_p + Bp * head_p))           # bias + f32 out

    out = pl.pallas_call(
        _policy_fwd_kernel,
        out_shape=jax.ShapeDtypeStruct((Bp, head_p), jnp.float32),
        grid=(n_tiles,),
        in_specs=[
            pl.BlockSpec((TB, num_inputs), lambda i: (i, 0)),        # streamed
            pl.BlockSpec((num_inputs, hidden_dim), lambda i: (0, 0)),  # resident
            pl.BlockSpec((hidden_dim, hidden_dim), lambda i: (0, 0)),
            pl.BlockSpec((hidden_dim, feat_dim), lambda i: (0, 0)),
            pl.BlockSpec((feat_dim, head_p), lambda i: (0, 0)),
            pl.BlockSpec((1, head_p), lambda i: (0, 0)),
        ],
        out_specs=pl.BlockSpec((TB, head_p), lambda i: (i, 0)),
        compiler_params=pltpu.CompilerParams(
            dimension_semantics=("parallel",)),
        cost_estimate=pl.CostEstimate(flops=flops, transcendentals=0,
                                      bytes_accessed=bytes_accessed),
    )(x_p, w1t, w2t, w3t, wh_t, bh)

    # Unpack the fused head (glue on tiny (B, A) slices, outside the kernel).
    mean = out[:B, :num_actions]
    log_std = jnp.clip(out[:B, num_actions:2 * num_actions],
                       LOG_SIG_MIN, LOG_SIG_MAX)
    return mean, log_std


def _xavier_uniform(key, shape, dtype=jnp.float32):
    fan_out, fan_in = shape
    limit = jnp.sqrt(6.0 / (fan_in + fan_out))
    return jax.random.uniform(key, shape, dtype, minval=-limit, maxval=limit)


if __name__ == "__main__":
    # Small deterministic problem consistent with the module.
    num_inputs, hidden_dim, shared_feature_dim = 16, 32, 64
    num_actions, num_tasks, B = 6, 3, 8
    task_id = 1

    key = jax.random.PRNGKey(0)
    keys = jax.random.split(key, 4 + num_tasks)
    k1, k2, k3, kx = keys[:4]
    task_keys = keys[4:]

    w1 = _xavier_uniform(k1, (hidden_dim, num_inputs))
    w2 = _xavier_uniform(k2, (hidden_dim, hidden_dim))
    w3 = _xavier_uniform(k3, (shared_feature_dim, hidden_dim))

    mean_w, mean_b, lstd_w, lstd_b = [], [], [], []
    for t in range(num_tasks):
        km, kmb, ks, ksb = jax.random.split(task_keys[t], 4)
        mean_w.append(_xavier_uniform(km, (num_actions, shared_feature_dim)))
        lstd_w.append(_xavier_uniform(ks, (num_actions, shared_feature_dim)))
        bound = 1.0 / jnp.sqrt(shared_feature_dim)
        mean_b.append(jax.random.uniform(kmb, (num_actions,), jnp.float32,
                                         minval=-bound, maxval=bound))
        lstd_b.append(jax.random.uniform(ksb, (num_actions,), jnp.float32,
                                         minval=-bound, maxval=bound))

    state = jax.random.normal(kx, (B, num_inputs), jnp.float32)

    mean, log_std = ewc_gaussian_policy_forward(
        state, w1, w2, w3,
        mean_w[task_id], mean_b[task_id], lstd_w[task_id], lstd_b[task_id])
    mean = jax.block_until_ready(mean)
    log_std = jax.block_until_ready(log_std)

    # Reference with the SAME bf16-operand / f32-accumulation arithmetic so the
    # comparison is tight (the only semantic difference vs the pure-f32 torch
    # forward is bf16 operand rounding).
    bf = lambda a: a.astype(jnp.bfloat16)
    f32 = jnp.float32
    h = jnp.maximum(jnp.dot(bf(state), bf(w1).T, preferred_element_type=f32), 0.0)
    h = jnp.maximum(jnp.dot(bf(h), bf(w2).T, preferred_element_type=f32), 0.0)
    h = jnp.maximum(jnp.dot(bf(h), bf(w3).T, preferred_element_type=f32), 0.0)
    ref_mean = jnp.dot(bf(h), bf(mean_w[task_id]).T,
                       preferred_element_type=f32) + mean_b[task_id]
    ref_log_std = jnp.clip(jnp.dot(bf(h), bf(lstd_w[task_id]).T,
                                   preferred_element_type=f32) + lstd_b[task_id],
                           LOG_SIG_MIN, LOG_SIG_MAX)

    assert mean.shape == (B, num_actions)
    assert log_std.shape == (B, num_actions)
    assert jnp.allclose(mean, ref_mean, atol=1e-4, rtol=1e-4)
    assert jnp.allclose(log_std, ref_log_std, atol=1e-4, rtol=1e-4)

    # TODO(synk): sample() (Normal.rsample + tanh squash log-prob) and the
    # zero_grad()/EWC bookkeeping are training/stochastic utilities outside
    # forward(); not implemented as kernels here.

    print("KERNEL_OK")
</pallas_src>

<mosaic_0001>
module attributes {stable_mosaic.version = 11 : i64} {
  func.func @_policy_fwd_kernel(%arg0: i32, %arg1: memref<16x16xbf16, #tpu.memory_space<vmem>>, %arg2: memref<16x32xbf16, #tpu.memory_space<vmem>>, %arg3: memref<32x32xbf16, #tpu.memory_space<vmem>>, %arg4: memref<32x64xbf16, #tpu.memory_space<vmem>>, %arg5: memref<64x128xbf16, #tpu.memory_space<vmem>>, %arg6: memref<1x128xf32, #tpu.memory_space<vmem>>, %arg7: memref<16x128xf32, #tpu.memory_space<vmem>>) attributes {dimension_semantics = [#tpu.dimension_semantics<parallel>], iteration_bounds = array<i64: 1>, scalar_prefetch = 0 : i64, scratch_operands = 0 : i64, tpu.core_type = #tpu.core_type<tc>, window_params = [{transform_indices = @transform_0, window_bounds = array<i64: 16, 16>}, {pipeline_mode = #tpu.pipeline_mode<synchronous>, transform_indices = @transform_1, window_bounds = array<i64: 16, 32>}, {pipeline_mode = #tpu.pipeline_mode<synchronous>, transform_indices = @transform_2, window_bounds = array<i64: 32, 32>}, {pipeline_mode = #tpu.pipeline_mode<synchronous>, transform_indices = @transform_3, window_bounds = array<i64: 32, 64>}, {pipeline_mode = #tpu.pipeline_mode<synchronous>, transform_indices = @transform_4, window_bounds = array<i64: 64, 128>}, {pipeline_mode = #tpu.pipeline_mode<synchronous>, transform_indices = @transform_5, window_bounds = array<i64: 1, 128>}, {transform_indices = @transform_6, window_bounds = array<i64: 16, 128>}]} {
    %c0 = arith.constant 0 : index
    %c0_0 = arith.constant 0 : index
    %0 = vector.load %arg1[%c0, %c0_0] : memref<16x16xbf16, #tpu.memory_space<vmem>>, vector<16x16xbf16>
    %c0_1 = arith.constant 0 : index
    %c0_2 = arith.constant 0 : index
    %1 = vector.load %arg2[%c0_1, %c0_2] : memref<16x32xbf16, #tpu.memory_space<vmem>>, vector<16x32xbf16>
    %cst = arith.constant dense<0.000000e+00> : vector<16x32xf32>
    %2 = tpu.matmul %0, %1, %cst {dimension_numbers = #tpu.dot_dimension_numbers<[1], [0], [0], [1], [0, 0, 1, 1], [], []>} : vector<16x16xbf16>, vector<16x32xbf16>, vector<16x32xf32> -> vector<16x32xf32>
    %cst_3 = arith.constant 0.000000e+00 : f32
    %3 = vector.broadcast %cst_3 : f32 to vector<16x32xf32>
    %4 = arith.maximumf %2, %3 : vector<16x32xf32>
    %5 = arith.truncf %4 : vector<16x32xf32> to vector<16x32xbf16>
    %c0_4 = arith.constant 0 : index
    %c0_5 = arith.constant 0 : index
    %6 = vector.load %arg3[%c0_4, %c0_5] : memref<32x32xbf16, #tpu.memory_space<vmem>>, vector<32x32xbf16>
    %cst_6 = arith.constant dense<0.000000e+00> : vector<16x32xf32>
    %7 = tpu.matmul %5, %6, %cst_6 {dimension_numbers = #tpu.dot_dimension_numbers<[1], [0], [0], [1], [0, 0, 1, 1], [], []>} : vector<16x32xbf16>, vector<32x32xbf16>, vector<16x32xf32> -> vector<16x32xf32>
    %cst_7 = arith.constant 0.000000e+00 : f32
    %8 = vector.broadcast %cst_7 : f32 to vector<16x32xf32>
    %9 = arith.maximumf %7, %8 : vector<16x32xf32>
    %10 = arith.truncf %9 : vector<16x32xf32> to vector<16x32xbf16>
    %c0_8 = arith.constant 0 : index
    %c0_9 = arith.constant 0 : index
    %11 = vector.load %arg4[%c0_8, %c0_9] : memref<32x64xbf16, #tpu.memory_space<vmem>>, vector<32x64xbf16>
    %cst_10 = arith.constant dense<0.000000e+00> : vector<16x64xf32>
    %12 = tpu.matmul %10, %11, %cst_10 {dimension_numbers = #tpu.dot_dimension_numbers<[1], [0], [0], [1], [0, 0, 1, 1], [], []>} : vector<16x32xbf16>, vector<32x64xbf16>, vector<16x64xf32> -> vector<16x64xf32>
    %cst_11 = arith.constant 0.000000e+00 : f32
    %13 = vector.broadcast %cst_11 : f32 to vector<16x64xf32>
    %14 = arith.maximumf %12, %13 : vector<16x64xf32>
    %15 = arith.truncf %14 : vector<16x64xf32> to vector<16x64xbf16>
    %c0_12 = arith.constant 0 : index
    %c0_13 = arith.constant 0 : index
    %16 = vector.load %arg5[%c0_12, %c0_13] : memref<64x128xbf16, #tpu.memory_space<vmem>>, vector<64x128xbf16>
    %cst_14 = arith.constant dense<0.000000e+00> : vector<16x128xf32>
    %17 = tpu.matmul %15, %16, %cst_14 {dimension_numbers = #tpu.dot_dimension_numbers<[1], [0], [0], [1], [0, 0, 1, 1], [], []>} : vector<16x64xbf16>, vector<64x128xbf16>, vector<16x128xf32> -> vector<16x128xf32>
    %c0_15 = arith.constant 0 : index
    %c0_16 = arith.constant 0 : index
    %18 = vector.load %arg6[%c0_15, %c0_16] : memref<1x128xf32, #tpu.memory_space<vmem>>, vector<1x128xf32>
    %19 = vector.broadcast %18 : vector<1x128xf32> to vector<16x128xf32>
    %20 = arith.addf %17, %19 : vector<16x128xf32>
    %c0_17 = arith.constant 0 : index
    %c0_18 = arith.constant 0 : index
    %21 = vector.load %arg7[%c0_17, %c0_18] : memref<16x128xf32, #tpu.memory_space<vmem>>, vector<16x128xf32>
    tpu.vector_store %arg7[%c0_17, %c0_18], %20 {strides = array<i32>} : memref<16x128xf32, #tpu.memory_space<vmem>>, vector<16x128xf32>,
    return
  }
  func.func @transform_0(%arg0: i32) -> (i32, i32) {
    %c0_i32 = arith.constant 0 : i32
    %c0_i32_0 = arith.constant 0 : i32
    return %arg0, %c0_i32 : i32, i32
  }
  func.func @transform_1(%arg0: i32) -> (i32, i32) {
    %c0_i32 = arith.constant 0 : i32
    %c0_i32_0 = arith.constant 0 : i32
    %c0_i32_1 = arith.constant 0 : i32
    return %c0_i32, %c0_i32_0 : i32, i32
  }
  func.func @transform_2(%arg0: i32) -> (i32, i32) {
    %c0_i32 = arith.constant 0 : i32
    %c0_i32_0 = arith.constant 0 : i32
    %c0_i32_1 = arith.constant 0 : i32
    return %c0_i32, %c0_i32_0 : i32, i32
  }
  func.func @transform_3(%arg0: i32) -> (i32, i32) {
    %c0_i32 = arith.constant 0 : i32
    %c0_i32_0 = arith.constant 0 : i32
    %c0_i32_1 = arith.constant 0 : i32
    return %c0_i32, %c0_i32_0 : i32, i32
  }
  func.func @transform_4(%arg0: i32) -> (i32, i32) {
    %c0_i32 = arith.constant 0 : i32
    %c0_i32_0 = arith.constant 0 : i32
    %c0_i32_1 = arith.constant 0 : i32
    return %c0_i32, %c0_i32_0 : i32, i32
  }
  func.func @transform_5(%arg0: i32) -> (i32, i32) {
    %c0_i32 = arith.constant 0 : i32
    %c0_i32_0 = arith.constant 0 : i32
    %c0_i32_1 = arith.constant 0 : i32
    return %c0_i32, %c0_i32_0 : i32, i32
  }
  func.func @transform_6(%arg0: i32) -> (i32, i32) {
    %c0_i32 = arith.constant 0 : i32
    %c0_i32_0 = arith.constant 0 : i32
    return %arg0, %c0_i32 : i32, i32
  }
}

</mosaic_0001>

<bundles_post_ra>
// kernel: ewc_gaussian_policy_forward.1
= control target key start
LH: loop header
LB: loop body
LE: loop exit
PB: predicated region body
PF: predicated region fallthrough
CT: control target
= control target key end

     0   :  { %v378_v0 = vmov 0.0   ;;  %vm379_vm0 = vmmov 0   ;;  %vm39_vm1 = vcmask 130048   ;;  %vm103_vm2 = vcmask 261120   ;;  %s460_s1 = inlined_call_operand.vmem [shape: bf16[16,32], index: 1, kind: input, shape index: {}]   ;;  %s461_s0 = inlined_call_operand.vmem [shape: bf16[16,16], index: 0, kind: input, shape index: {}]   ;;  %s462_s2 = inlined_call_operand.vmem [shape: bf16[32,32], index: 2, kind: input, shape index: {}]   ;;  %s463_s3 = inlined_call_operand.vmem [shape: bf16[32,64], index: 3, kind: input, shape index: {}]   ;;  %s464_s4 = inlined_call_operand.vmem [shape: bf16[64,128], index: 4, kind: input, shape index: {}]   ;;  %s465_s5 = inlined_call_operand.vmem [shape: f32[1,128], index: 5, kind: input, shape index: {}]   ;;  %s466_s6 = inlined_call_operand.vmem [shape: f32[16,128], index: 6, kind: output, shape index: {}]  }
   0x1   :  { %332 = vmatprep.subr.bf16.mxu0 %v378_v0  ;;  %v368_v1 = vld [vmem:[%s460_s1] sm:$0xff]   ;;  %334 = vmatprep.mubr.msk.bf16.mxu0 %vm379_vm0, %v378_v0  ;;  %v371_v4 = vld [vmem:[%s462_s2 + $0x8] sm:$0xff]   ;;  %v376_v23 = vld [vmem:[%s464_s4 + $0x10] sm:$0xff]   ;;  %vm253_vm3 = vcmask 523264  }
   0x2   :  { %v369_v2 = vld [vmem:[%s461_s0] sm:$0xff]   ;;  %354 = vmatprep.subr.bf16.mxu1 %v378_v0  ;;  %362 = vmatprep.mubr.msk.bf16.mxu1 %vm379_vm0, %v378_v0  ;;  %v373_v13 = vld [vmem:[%s463_s3 + $0x8] sm:$0xff]   ;;  %v377_v24 = vld [vmem:[%s464_s4 + $0x18] sm:$0xff]  }
   0x3   :  { %333 = vmatpush3.bf16.msra.mxu0 %v368_v1  ;;  %v370_v3 = vld [vmem:[%s462_s2] sm:$0xff]   ;;  %v375_v15 = vld [vmem:[%s464_s4 + $0x8] sm:$0xff]  }
   0x4   :  { %338 = vmatprep.subr.bf16.mxu0 %v378_v0  ;;  %v372_v11 = vld [vmem:[%s463_s3] sm:$0xff]  }
   0x5   :  { %v374_v14 = vld [vmem:[%s464_s4] sm:$0xff]  }
   0x6   :  { %335 = vmatmul.mubr.msk.bf16.vlgmr.msra.gmra.mrb[0].mxu0 %vm39_vm1, %v369_v2  ;;  %355 = vmatpush3.bf16.msra.mxu1 %v374_v14  ;;  %v313_v32 = vld [vmem:[%s465_s5] ss:$0 sm:$0xff] }
   0x7   :  { %339 = vmatpush3.bf16.msra.mxu0 %v370_v3  ;;  %342 = vmatprep.mubr.msk.bf16.mxu0 %vm379_vm0, %v378_v0 }
   0x8   :  { %340 = vmatprep.subr.bf16.mxu0 %v378_v0  ;;  %356 = vmatprep.subr.bf16.mxu1 %v378_v0 }
   0xa   :  { %357 = vmatpush3.bf16.msra.mxu1 %v375_v15 }
   0xb   :  { %341 = vmatpush3.bf16.msra.mxu0 %v371_v4  ;;  %358 = vmatprep.subr.bf16.mxu1 %v378_v0 }
   0xc   :  { %346 = vmatprep.subr.bf16.mxu0 %v378_v0 }
   0xe   :  { %359 = vmatpush3.bf16.msra.mxu1 %v376_v23 }
   0xf   :  { %360 = vmatprep.subr.bf16.mxu1 %v378_v0 }
  0x12   :  { %361 = vmatpush3.bf16.msra.mxu1 %v377_v24 }
  0xd9   :  { %v77_v5 = vpop.f32.mrb[0].mxu0 }
  0xda   :  { %v336_v6 = vpop.f32.mrb[1].mxu0  ;;  %v84_v8 = vmax.f32 %v77_v5, 0.0 }
  0xdb   :  { %v80_v7 = vpop.f32.mrb[2].mxu0 }
  0xdc   :  { %v85_v9 = vmax.f32 %v80_v7, 0.0  ;;  %v337_v10 = vpop.f32.mrb[3].mxu0 }
  0xde   :  { %v86_v12 = vpack.c.bf16 %v85_v9, %v84_v8 }
  0xe0   :  { %343 = vmatmul.mubr.msk.bf16.vlgmr.msra.gmra.mrb[4].mxu0 %vm103_vm2, %v86_v12 }
  0xe1   :  { %347 = vmatpush3.bf16.msra.mxu0 %v372_v11  ;;  %350 = vmatprep.mubr.msk.bf16.mxu0 %vm379_vm0, %v378_v0 }
  0xe2   :  { %348 = vmatprep.subr.bf16.mxu0 %v378_v0 }
  0xe5   :  { %349 = vmatpush3.bf16.msra.mxu0 %v373_v13 }
 0x1b3   :  { %v141_v16 = vpop.f32.mrb[4].mxu0 }
 0x1b4   :  { %v344_v17 = vpop.f32.mrb[5].mxu0  ;;  %v148_v19 = vmax.f32 %v141_v16, 0.0 }
 0x1b5   :  { %v144_v18 = vpop.f32.mrb[6].mxu0 }
 0x1b6   :  { %v149_v20 = vmax.f32 %v144_v18, 0.0  ;;  %v345_v21 = vpop.f32.mrb[7].mxu0 }
 0x1b8   :  { %v150_v22 = vpack.c.bf16 %v149_v20, %v148_v19 }
 0x1ba   :  { %351 = vmatmul.mubr.msk.bf16.vlgmr.msra.gmra.mrb[8].mxu0 %vm103_vm2, %v150_v22 }
 0x28d   :  { %v204_v25 = vpop.f32.mrb[8].mxu0 }
 0x28e   :  { %v352_v26 = vpop.f32.mrb[9].mxu0  ;;  %v211_v28 = vmax.f32 %v204_v25, 0.0 }
 0x28f   :  { %v207_v27 = vpop.f32.mrb[10].mxu0 }
 0x290   :  { %v212_v29 = vmax.f32 %v207_v27, 0.0  ;;  %v353_v30 = vpop.f32.mrb[11].mxu0 }
 0x292   :  { %v213_v31 = vpack.c.bf16 %v212_v29, %v211_v28 }
 0x294   :  { %363 = vmatmul.mubr.msk.bf16.vlgmr.msra.gmra.mrb[0].mxu1 %vm253_vm3, %v213_v31 }
 0x367   :  { %v291_v33 = vpop.f32.mrb[0].mxu1 }
 0x368   :  { %v292_v34 = vadd.f32 %v313_v32, %v291_v33  ;;  %v364_v35 = vpop.f32.mrb[1].mxu1 }
 0x369   :  { %v294_v36 = vpop.f32.mrb[2].mxu1 }
 0x36a   :  { %298 = vst [vmem:[%s466_s6] sm:$0xff] %v292_v34  ;;  %v295_v37 = vadd.f32 %v313_v32, %v294_v36  ;;  %v365_v38 = vpop.f32.mrb[3].mxu1 }
 0x36c   :  { %299 = vst [vmem:[%s466_s6 + $0x8] sm:$0xff] %v295_v37 }

</bundles_post_ra>
